<compile_context>
chip_gen: v5e
topology: v5e:2x2
jax: 0.10.0
libtpu: 0.0.40
codegen_flags: <defaults>
</compile_context>

<pallas_src>
import functools

import jax
import jax.numpy as jnp
from jax.experimental import pallas as pl
from jax.experimental.pallas import tpu as pltpu


_LANE = 128
_MAX_TILE_LANES = 8192        # bounds the unrolled lane-fold (<= 64 chunks)
_NUM_SPLITS = 2               # leading 'parallel' axis -> both TCs on v7x


def _round_up(x, m):
    return ((x + m - 1) // m) * m


def _vmem_capacity_bytes():
    """Best-effort VMEM capacity query; conservative (v7x) fallback."""
    try:
        info = pltpu.get_tpu_info()
        cap = int(getattr(info, "vmem_capacity_bytes", 0) or 0)
        if cap > 0:
            return cap
    except Exception:
        pass
    return 64 * 1024 * 1024


def _choose_tile(rows, sum_itembytes, hw, budget):
    """Lane-tile width: a multiple of 128, sized by bytes to fill the budget."""
    per_col = 2 * rows * sum_itembytes            # double-buffered, all 3 streams
    max_cols = max(budget // max(per_col, 1), _LANE)
    tile = min(max_cols, _MAX_TILE_LANES, _round_up(hw, _LANE))
    return max((tile // _LANE) * _LANE, _LANE)


def _pad_small(o, t, m, hw):
    """Pad spatial dims < 128 up to one lane-tile with a self-masking pad."""
    if hw % _LANE == 0 or hw > _LANE:
        return o, t, m, hw
    pad = _LANE - hw
    o = jnp.pad(o, ((0, 0), (0, pad)))
    t = jnp.pad(t, ((0, 0), (0, pad)))
    m = jnp.pad(m, ((0, 0), (0, pad)), constant_values=1)   # >0 => masked out
    return o, t, m, _LANE


def _fold_lanes(x):
    """(rows, w) -> (rows, 128): sum aligned 128-lane column slices.

    Slices sit on vreg boundaries, so this is pure VALU adds — no XLU
    cross-lane reduce, no relayout.  w must be a multiple of 128.
    """
    _, w = x.shape
    acc = x[:, 0:_LANE]
    for k in range(1, w // _LANE):
        acc = acc + x[:, k * _LANE:(k + 1) * _LANE]
    return acc


def _accumulate(o_ref, t_ref, m_ref, num_ref, den_ref, *, col_base=None, hw=None):
    """Add this tile's per-row |masked diff| and mask-weight partials.

    col_base / hw are passed only for the (static) ragged last tile of a scale;
    interior tiles take the fast path (no iota / compare / selects).
    """
    mskf = m_ref[...].astype(jnp.float32)
    # PyTorch: m[m > 0] = 1 ; m = 1 - m  (kept exact: masks may be float/negative)
    m_inv = jnp.where(mskf > 0, 0.0, 1.0 - mskf)
    if col_base is not None:
        col = jax.lax.broadcasted_iota(jnp.int32, o_ref.shape, 1) + col_base
        valid = col < hw
        m_inv = jnp.where(valid, m_inv, 0.0)
    diff = jnp.abs(
        (o_ref[...].astype(jnp.float32) - t_ref[...].astype(jnp.float32)) * m_inv)
    if col_base is not None:
        diff = jnp.where(valid, diff, 0.0)        # OOB lanes may hold NaN/Inf
    num_ref[...] += _fold_lanes(diff)[None]
    den_ref[...] += _fold_lanes(m_inv)[None]


def _fused_kernel(o0_ref, t0_ref, m0_ref, o1_ref, t1_ref, m1_ref,
                  num0_ref, den0_ref, num1_ref, den1_ref,
                  *, steps_per_split, n0, n1, tile0, tile1, hw0, hw1,
                  ragged0, ragged1):
    p = pl.program_id(0)
    j = pl.program_id(1)
    # Combined tile index: [0, n0) -> scale 0, [n0, n0+n1) -> scale 1.
    t = p * steps_per_split + j

    @pl.when(j == 0)
    def _init():
        num0_ref[...] = jnp.zeros_like(num0_ref)
        den0_ref[...] = jnp.zeros_like(den0_ref)
        num1_ref[...] = jnp.zeros_like(num1_ref)
        den1_ref[...] = jnp.zeros_like(den1_ref)

    # ---------------- scale 0 ----------------
    if ragged0:
        @pl.when(t < n0 - 1)
        def _s0_fast():
            _accumulate(o0_ref, t0_ref, m0_ref, num0_ref, den0_ref)

        @pl.when(t == n0 - 1)
        def _s0_last():
            _accumulate(o0_ref, t0_ref, m0_ref, num0_ref, den0_ref,
                        col_base=(n0 - 1) * tile0, hw=hw0)
    else:
        @pl.when(t < n0)
        def _s0():
            _accumulate(o0_ref, t0_ref, m0_ref, num0_ref, den0_ref)

    # ---------------- scale 1 ----------------
    if ragged1:
        @pl.when((t >= n0) & (t < n0 + n1 - 1))
        def _s1_fast():
            _accumulate(o1_ref, t1_ref, m1_ref, num1_ref, den1_ref)

        @pl.when(t == n0 + n1 - 1)
        def _s1_last():
            _accumulate(o1_ref, t1_ref, m1_ref, num1_ref, den1_ref,
                        col_base=(n1 - 1) * tile1, hw=hw1)
    else:
        @pl.when((t >= n0) & (t < n0 + n1))
        def _s1():
            _accumulate(o1_ref, t1_ref, m1_ref, num1_ref, den1_ref)


def masked_ml_l1_loss(outputs, targets, masks, reduction="mean"):
    """JAX/Pallas equivalent of MaskedMLL1Loss.forward ('mean' reduction)."""
    del reduction  # kept for signature parity with the PyTorch module
    o0, o1 = outputs
    t0, t1 = targets
    m0, m1 = masks
    b, c0, h0, w0 = o0.shape
    _, c1, h1, w1 = o1.shape
    r0, hw0 = b * c0, h0 * w0
    r1, hw1 = b * c1, h1 * w1

    # Contiguous NCHW -> (B*C, H*W) flatten: free, no dtype casts.
    o0 = o0.reshape(r0, hw0); t0 = t0.reshape(r0, hw0); m0 = m0.reshape(r0, hw0)
    o1 = o1.reshape(r1, hw1); t1 = t1.reshape(r1, hw1); m1 = m1.reshape(r1, hw1)

    # Only tiny (< 128 lane) spatial dims are padded; larger non-multiples of
    # 128 are handled in-kernel by ragged masking of the last tile.
    o0, t0, m0, hw0 = _pad_small(o0, t0, m0, hw0)
    o1, t1, m1, hw1 = _pad_small(o1, t1, m1, hw1)

    cap = _vmem_capacity_bytes()
    budget = cap // 5                     # per-scale; both scales stay resident
    sum0 = o0.dtype.itemsize + t0.dtype.itemsize + m0.dtype.itemsize
    sum1 = o1.dtype.itemsize + t1.dtype.itemsize + m1.dtype.itemsize
    tile0 = _choose_tile(r0, sum0, hw0, budget)
    tile1 = _choose_tile(r1, sum1, hw1, budget)
    n0 = pl.cdiv(hw0, tile0)
    n1 = pl.cdiv(hw1, tile1)
    total = n0 + n1
    steps = pl.cdiv(total, _NUM_SPLITS)

    kernel = functools.partial(
        _fused_kernel,
        steps_per_split=steps, n0=n0, n1=n1, tile0=tile0, tile1=tile1,
        hw0=hw0, hw1=hw1,
        ragged0=(n0 * tile0 != hw0), ragged1=(n1 * tile1 != hw1))

    # Clamped index maps: the inactive scale's block index stays constant while
    # the other scale is processed -> no redundant DMA.
    def map0(p, j):
        return (0, jnp.minimum(p * steps + j, n0 - 1))

    def map1(p, j):
        return (0, jnp.clip(p * steps + j - n0, 0, n1 - 1))

    out_map = lambda p, j: (p, 0, 0)

    acc_shapes = [jax.ShapeDtypeStruct((_NUM_SPLITS, r0, _LANE), jnp.float32),
                  jax.ShapeDtypeStruct((_NUM_SPLITS, r0, _LANE), jnp.float32),
                  jax.ShapeDtypeStruct((_NUM_SPLITS, r1, _LANE), jnp.float32),
                  jax.ShapeDtypeStruct((_NUM_SPLITS, r1, _LANE), jnp.float32)]
    acc_specs = [pl.BlockSpec((1, r0, _LANE), out_map),
                 pl.BlockSpec((1, r0, _LANE), out_map),
                 pl.BlockSpec((1, r1, _LANE), out_map),
                 pl.BlockSpec((1, r1, _LANE), out_map)]

    in_bytes = sum(x.size * x.dtype.itemsize for x in (o0, t0, m0, o1, t1, m1))
    out_bytes = _NUM_SPLITS * (2 * r0 + 2 * r1) * _LANE * 4
    flops = 8 * (r0 * hw0 + r1 * hw1)

    grid_spec = pltpu.PrefetchScalarGridSpec(
        num_scalar_prefetch=0,
        grid=(_NUM_SPLITS, steps),
        in_specs=[pl.BlockSpec((r0, tile0), map0),
                  pl.BlockSpec((r0, tile0), map0),
                  pl.BlockSpec((r0, tile0), map0),
                  pl.BlockSpec((r1, tile1), map1),
                  pl.BlockSpec((r1, tile1), map1),
                  pl.BlockSpec((r1, tile1), map1)],
        out_specs=acc_specs,
    )

    num0_p, den0_p, num1_p, den1_p = pl.pallas_call(
        kernel,
        out_shape=acc_shapes,
        grid_spec=grid_spec,
        compiler_params=pltpu.CompilerParams(
            dimension_semantics=("parallel", "arbitrary"),
            vmem_limit_bytes=(cap * 3) // 4),
        cost_estimate=pl.CostEstimate(
            flops=flops, transcendentals=0,
            bytes_accessed=in_bytes + out_bytes),
    )(o0, t0, m0, o1, t1, m1)

    # Tiny finalize (a few XLA ops): combine core partials, cross-lane reduce,
    # divide per row, mean over batch.  0/0 -> NaN matches the PyTorch module.
    num0 = jnp.sum(num0_p, axis=(0, 2)); den0 = jnp.sum(den0_p, axis=(0, 2))
    num1 = jnp.sum(num1_p, axis=(0, 2)); den1 = jnp.sum(den1_p, axis=(0, 2))
    loss0 = jnp.sum(num0 / den0) / b
    loss1 = jnp.sum(num1 / den1) / b
    return loss0 + loss1


def _reference_loss(outputs, targets, masks):
    """Pure-JAX reference matching the PyTorch module, for verification."""
    bs = outputs[0].shape[0]
    total = jnp.float32(0.0)
    for o, t, m in zip(outputs, targets, masks):
        mf = m.astype(jnp.float32)
        mf = jnp.where(mf > 0, 1.0, mf)
        m_inv = 1.0 - mf
        diff = jnp.abs((o.astype(jnp.float32) - t.astype(jnp.float32)) * m_inv)
        num = diff.sum(axis=(2, 3))
        den = m_inv.sum(axis=(2, 3))
        total = total + (num / den).sum() / bs
    return total


if __name__ == "__main__":
    key = jax.random.PRNGKey(0)
    k = jax.random.split(key, 6)

    B, C = 2, 4
    H0, W0 = 16, 16
    H1, W1 = 8, 8

    # bf16 activations + int8 masks: the kernel streams the narrow dtypes and
    # widens to f32 on-chip (halves / quarters HBM traffic vs upfront casts).
    out0 = jax.random.normal(k[0], (B, C, H0, W0), dtype=jnp.bfloat16)
    tgt0 = jax.random.normal(k[1], (B, C, H0, W0), dtype=jnp.bfloat16)
    out1 = jax.random.normal(k[2], (B, C, H1, W1), dtype=jnp.bfloat16)
    tgt1 = jax.random.normal(k[3], (B, C, H1, W1), dtype=jnp.bfloat16)

    # Any value > 0 is treated as "masked out".
    msk0 = (jax.random.uniform(k[4], (B, C, H0, W0)) > 0.5).astype(jnp.int8) * 3
    msk1 = (jax.random.uniform(k[5], (B, C, H1, W1)) > 0.5).astype(jnp.int8) * 7

    outputs = [out0, out1]
    targets = [tgt0, tgt1]
    masks = [msk0, msk1]

    loss = jax.block_until_ready(masked_ml_l1_loss(outputs, targets, masks))
    ref = jax.block_until_ready(_reference_loss(outputs, targets, masks))
    assert jnp.allclose(loss, ref, rtol=1e-4, atol=1e-5), (loss, ref)

    print("KERNEL_OK")
</pallas_src>

<mosaic_0001>
module attributes {stable_mosaic.version = 11 : i64} {
  func.func @_fused_kernel(%arg0: i32, %arg1: i32, %arg2: memref<8x256xbf16, #tpu.memory_space<vmem>>, %arg3: memref<8x256xbf16, #tpu.memory_space<vmem>>, %arg4: memref<8x256xi8, #tpu.memory_space<vmem>>, %arg5: memref<8x128xbf16, #tpu.memory_space<vmem>>, %arg6: memref<8x128xbf16, #tpu.memory_space<vmem>>, %arg7: memref<8x128xi8, #tpu.memory_space<vmem>>, %arg8: memref<1x8x128xf32, #tpu.memory_space<vmem>>, %arg9: memref<1x8x128xf32, #tpu.memory_space<vmem>>, %arg10: memref<1x8x128xf32, #tpu.memory_space<vmem>>, %arg11: memref<1x8x128xf32, #tpu.memory_space<vmem>>) attributes {dimension_semantics = [#tpu.dimension_semantics<parallel>, #tpu.dimension_semantics<arbitrary>], iteration_bounds = array<i64: 2, 1>, scalar_prefetch = 0 : i64, scratch_operands = 0 : i64, tpu.core_type = #tpu.core_type<tc>, window_params = [{transform_indices = @transform_0, window_bounds = array<i64: 8, 256>}, {transform_indices = @transform_1, window_bounds = array<i64: 8, 256>}, {transform_indices = @transform_2, window_bounds = array<i64: 8, 256>}, {transform_indices = @transform_3, window_bounds = array<i64: 8, 128>}, {transform_indices = @transform_4, window_bounds = array<i64: 8, 128>}, {transform_indices = @transform_5, window_bounds = array<i64: 8, 128>}, {transform_indices = @transform_6, window_bounds = array<i64: 1, 8, 128>}, {transform_indices = @transform_7, window_bounds = array<i64: 1, 8, 128>}, {transform_indices = @transform_8, window_bounds = array<i64: 1, 8, 128>}, {transform_indices = @transform_9, window_bounds = array<i64: 1, 8, 128>}]} {
    %c1_i32 = arith.constant 1 : i32
    %0 = arith.muli %arg0, %c1_i32 : i32
    %1 = arith.addi %0, %arg1 : i32
    %c0_i32 = arith.constant 0 : i32
    %2 = arith.cmpi eq, %arg1, %c0_i32 : i32
    %3 = arith.extui %2 : i1 to i32
    %c0_i32_0 = arith.constant 0 : i32
    %4 = arith.cmpi ne, %3, %c0_i32_0 : i32
    scf.if %4 {
      %cst = arith.constant 0.000000e+00 : f32
      %13 = vector.broadcast %cst : f32 to vector<1x8x128xf32>
      %c0 = arith.constant 0 : index
      %c0_5 = arith.constant 0 : index
      %c0_6 = arith.constant 0 : index
      %14 = vector.load %arg8[%c0, %c0_5, %c0_6] : memref<1x8x128xf32, #tpu.memory_space<vmem>>, vector<1x8x128xf32>
      tpu.vector_store %arg8[%c0, %c0_5, %c0_6], %13 {strides = array<i32>} : memref<1x8x128xf32, #tpu.memory_space<vmem>>, vector<1x8x128xf32>,
      %cst_7 = arith.constant 0.000000e+00 : f32
      %15 = vector.broadcast %cst_7 : f32 to vector<1x8x128xf32>
      %c0_8 = arith.constant 0 : index
      %c0_9 = arith.constant 0 : index
      %c0_10 = arith.constant 0 : index
      %16 = vector.load %arg9[%c0_8, %c0_9, %c0_10] : memref<1x8x128xf32, #tpu.memory_space<vmem>>, vector<1x8x128xf32>
      tpu.vector_store %arg9[%c0_8, %c0_9, %c0_10], %15 {strides = array<i32>} : memref<1x8x128xf32, #tpu.memory_space<vmem>>, vector<1x8x128xf32>,
      %cst_11 = arith.constant 0.000000e+00 : f32
      %17 = vector.broadcast %cst_11 : f32 to vector<1x8x128xf32>
      %c0_12 = arith.constant 0 : index
      %c0_13 = arith.constant 0 : index
      %c0_14 = arith.constant 0 : index
      %18 = vector.load %arg10[%c0_12, %c0_13, %c0_14] : memref<1x8x128xf32, #tpu.memory_space<vmem>>, vector<1x8x128xf32>
      tpu.vector_store %arg10[%c0_12, %c0_13, %c0_14], %17 {strides = array<i32>} : memref<1x8x128xf32, #tpu.memory_space<vmem>>, vector<1x8x128xf32>,
      %cst_15 = arith.constant 0.000000e+00 : f32
      %19 = vector.broadcast %cst_15 : f32 to vector<1x8x128xf32>
      %c0_16 = arith.constant 0 : index
      %c0_17 = arith.constant 0 : index
      %c0_18 = arith.constant 0 : index
      %20 = vector.load %arg11[%c0_16, %c0_17, %c0_18] : memref<1x8x128xf32, #tpu.memory_space<vmem>>, vector<1x8x128xf32>
      tpu.vector_store %arg11[%c0_16, %c0_17, %c0_18], %19 {strides = array<i32>} : memref<1x8x128xf32, #tpu.memory_space<vmem>>, vector<1x8x128xf32>,
    } else {
    }
    %c1_i32_1 = arith.constant 1 : i32
    %5 = arith.cmpi slt, %1, %c1_i32_1 : i32
    %6 = arith.extui %5 : i1 to i32
    %c0_i32_2 = arith.constant 0 : i32
    %7 = arith.cmpi ne, %6, %c0_i32_2 : i32
    scf.if %7 {
      %c0 = arith.constant 0 : index
      %c0_5 = arith.constant 0 : index
      %13 = vector.load %arg4[%c0, %c0_5] : memref<8x256xi8, #tpu.memory_space<vmem>>, vector<8x256xi8>
      %14 = arith.sitofp %13 : vector<8x256xi8> to vector<8x256xf32>
      %cst = arith.constant 0.000000e+00 : f32
      %15 = vector.broadcast %cst : f32 to vector<8x256xf32>
      %16 = arith.cmpf ogt, %14, %15 : vector<8x256xf32>
      %cst_6 = arith.constant 1.000000e+00 : f32
      %17 = vector.broadcast %cst_6 : f32 to vector<8x256xf32>
      %18 = arith.subf %17, %14 : vector<8x256xf32>
      %cst_7 = arith.constant 0.000000e+00 : f32
      %19 = vector.broadcast %cst_7 : f32 to vector<8x256xf32>
      %20 = arith.select %16, %19, %18 : vector<8x256xi1>, vector<8x256xf32>
      %c0_8 = arith.constant 0 : index
      %c0_9 = arith.constant 0 : index
      %21 = vector.load %arg2[%c0_8, %c0_9] : memref<8x256xbf16, #tpu.memory_space<vmem>>, vector<8x256xbf16>
      %22 = arith.extf %21 : vector<8x256xbf16> to vector<8x256xf32>
      %c0_10 = arith.constant 0 : index
      %c0_11 = arith.constant 0 : index
      %23 = vector.load %arg3[%c0_10, %c0_11] : memref<8x256xbf16, #tpu.memory_space<vmem>>, vector<8x256xbf16>
      %24 = arith.extf %23 : vector<8x256xbf16> to vector<8x256xf32>
      %25 = arith.subf %22, %24 : vector<8x256xf32>
      %26 = arith.mulf %25, %20 : vector<8x256xf32>
      %27 = math.absf %26 : vector<8x256xf32>
      %c0_12 = arith.constant 0 : index
      %c0_13 = arith.constant 0 : index
      %c0_14 = arith.constant 0 : index
      %28 = vector.load %arg8[%c0_12, %c0_13, %c0_14] : memref<1x8x128xf32, #tpu.memory_space<vmem>>, vector<1x8x128xf32>
      %29 = vector.extract_strided_slice %27 {offsets = [0, 0], sizes = [8, 128], strides = [1, 1]} : vector<8x256xf32> to vector<8x128xf32>
      %30 = vector.extract_strided_slice %27 {offsets = [0, 128], sizes = [8, 128], strides = [1, 1]} : vector<8x256xf32> to vector<8x128xf32>
      %31 = arith.addf %29, %30 : vector<8x128xf32>
      %32 = vector.shape_cast %31 : vector<8x128xf32> to vector<1x8x128xf32>
      %33 = arith.addf %28, %32 : vector<1x8x128xf32>
      %c0_15 = arith.constant 0 : index
      %c0_16 = arith.constant 0 : index
      %c0_17 = arith.constant 0 : index
      %34 = vector.load %arg8[%c0_15, %c0_16, %c0_17] : memref<1x8x128xf32, #tpu.memory_space<vmem>>, vector<1x8x128xf32>
      tpu.vector_store %arg8[%c0_15, %c0_16, %c0_17], %33 {strides = array<i32>} : memref<1x8x128xf32, #tpu.memory_space<vmem>>, vector<1x8x128xf32>,
      %c0_18 = arith.constant 0 : index
      %c0_19 = arith.constant 0 : index
      %c0_20 = arith.constant 0 : index
      %35 = vector.load %arg9[%c0_18, %c0_19, %c0_20] : memref<1x8x128xf32, #tpu.memory_space<vmem>>, vector<1x8x128xf32>
      %36 = vector.extract_strided_slice %20 {offsets = [0, 0], sizes = [8, 128], strides = [1, 1]} : vector<8x256xf32> to vector<8x128xf32>
      %37 = vector.extract_strided_slice %20 {offsets = [0, 128], sizes = [8, 128], strides = [1, 1]} : vector<8x256xf32> to vector<8x128xf32>
      %38 = arith.addf %36, %37 : vector<8x128xf32>
      %39 = vector.shape_cast %38 : vector<8x128xf32> to vector<1x8x128xf32>
      %40 = arith.addf %35, %39 : vector<1x8x128xf32>
      %c0_21 = arith.constant 0 : index
      %c0_22 = arith.constant 0 : index
      %c0_23 = arith.constant 0 : index
      %41 = vector.load %arg9[%c0_21, %c0_22, %c0_23] : memref<1x8x128xf32, #tpu.memory_space<vmem>>, vector<1x8x128xf32>
      tpu.vector_store %arg9[%c0_21, %c0_22, %c0_23], %40 {strides = array<i32>} : memref<1x8x128xf32, #tpu.memory_space<vmem>>, vector<1x8x128xf32>,
    } else {
    }
    %c1_i32_3 = arith.constant 1 : i32
    %8 = arith.cmpi sge, %1, %c1_i32_3 : i32
    %c2_i32 = arith.constant 2 : i32
    %9 = arith.cmpi slt, %1, %c2_i32 : i32
    %10 = arith.andi %8, %9 : i1
    %11 = arith.extui %10 : i1 to i32
    %c0_i32_4 = arith.constant 0 : i32
    %12 = arith.cmpi ne, %11, %c0_i32_4 : i32
    scf.if %12 {
      %c0 = arith.constant 0 : index
      %c0_5 = arith.constant 0 : index
      %13 = vector.load %arg7[%c0, %c0_5] : memref<8x128xi8, #tpu.memory_space<vmem>>, vector<8x128xi8>
      %14 = arith.sitofp %13 : vector<8x128xi8> to vector<8x128xf32>
      %cst = arith.constant 0.000000e+00 : f32
      %15 = vector.broadcast %cst : f32 to vector<8x128xf32>
      %16 = arith.cmpf ogt, %14, %15 : vector<8x128xf32>
      %cst_6 = arith.constant 1.000000e+00 : f32
      %17 = vector.broadcast %cst_6 : f32 to vector<8x128xf32>
      %18 = arith.subf %17, %14 : vector<8x128xf32>
      %cst_7 = arith.constant 0.000000e+00 : f32
      %19 = vector.broadcast %cst_7 : f32 to vector<8x128xf32>
      %20 = arith.select %16, %19, %18 : vector<8x128xi1>, vector<8x128xf32>
      %c0_8 = arith.constant 0 : index
      %c0_9 = arith.constant 0 : index
      %21 = vector.load %arg5[%c0_8, %c0_9] : memref<8x128xbf16, #tpu.memory_space<vmem>>, vector<8x128xbf16>
      %22 = arith.extf %21 : vector<8x128xbf16> to vector<8x128xf32>
      %c0_10 = arith.constant 0 : index
      %c0_11 = arith.constant 0 : index
      %23 = vector.load %arg6[%c0_10, %c0_11] : memref<8x128xbf16, #tpu.memory_space<vmem>>, vector<8x128xbf16>
      %24 = arith.extf %23 : vector<8x128xbf16> to vector<8x128xf32>
      %25 = arith.subf %22, %24 : vector<8x128xf32>
      %26 = arith.mulf %25, %20 : vector<8x128xf32>
      %27 = math.absf %26 : vector<8x128xf32>
      %c0_12 = arith.constant 0 : index
      %c0_13 = arith.constant 0 : index
      %c0_14 = arith.constant 0 : index
      %28 = vector.load %arg10[%c0_12, %c0_13, %c0_14] : memref<1x8x128xf32, #tpu.memory_space<vmem>>, vector<1x8x128xf32>
      %29 = vector.shape_cast %27 : vector<8x128xf32> to vector<1x8x128xf32>
      %30 = arith.addf %28, %29 : vector<1x8x128xf32>
      %c0_15 = arith.constant 0 : index
      %c0_16 = arith.constant 0 : index
      %c0_17 = arith.constant 0 : index
      %31 = vector.load %arg10[%c0_15, %c0_16, %c0_17] : memref<1x8x128xf32, #tpu.memory_space<vmem>>, vector<1x8x128xf32>
      tpu.vector_store %arg10[%c0_15, %c0_16, %c0_17], %30 {strides = array<i32>} : memref<1x8x128xf32, #tpu.memory_space<vmem>>, vector<1x8x128xf32>,
      %c0_18 = arith.constant 0 : index
      %c0_19 = arith.constant 0 : index
      %c0_20 = arith.constant 0 : index
      %32 = vector.load %arg11[%c0_18, %c0_19, %c0_20] : memref<1x8x128xf32, #tpu.memory_space<vmem>>, vector<1x8x128xf32>
      %33 = vector.shape_cast %20 : vector<8x128xf32> to vector<1x8x128xf32>
      %34 = arith.addf %32, %33 : vector<1x8x128xf32>
      %c0_21 = arith.constant 0 : index
      %c0_22 = arith.constant 0 : index
      %c0_23 = arith.constant 0 : index
      %35 = vector.load %arg11[%c0_21, %c0_22, %c0_23] : memref<1x8x128xf32, #tpu.memory_space<vmem>>, vector<1x8x128xf32>
      tpu.vector_store %arg11[%c0_21, %c0_22, %c0_23], %34 {strides = array<i32>} : memref<1x8x128xf32, #tpu.memory_space<vmem>>, vector<1x8x128xf32>,
    } else {
    }
    return
  }
  func.func @transform_0(%arg0: i32, %arg1: i32) -> (i32, i32) {
    %c1_i32 = arith.constant 1 : i32
    %0 = arith.muli %arg0, %c1_i32 : i32
    %1 = arith.addi %0, %arg1 : i32
    %c0_i32 = arith.constant 0 : i32
    %2 = arith.minsi %1, %c0_i32 : i32
    %c0_i32_0 = arith.constant 0 : i32
    %c0_i32_1 = arith.constant 0 : i32
    return %c0_i32_0, %2 : i32, i32
  }
  func.func @transform_1(%arg0: i32, %arg1: i32) -> (i32, i32) {
    %c1_i32 = arith.constant 1 : i32
    %0 = arith.muli %arg0, %c1_i32 : i32
    %1 = arith.addi %0, %arg1 : i32
    %c0_i32 = arith.constant 0 : i32
    %2 = arith.minsi %1, %c0_i32 : i32
    %c0_i32_0 = arith.constant 0 : i32
    %c0_i32_1 = arith.constant 0 : i32
    return %c0_i32_0, %2 : i32, i32
  }
  func.func @transform_2(%arg0: i32, %arg1: i32) -> (i32, i32) {
    %c1_i32 = arith.constant 1 : i32
    %0 = arith.muli %arg0, %c1_i32 : i32
    %1 = arith.addi %0, %arg1 : i32
    %c0_i32 = arith.constant 0 : i32
    %2 = arith.minsi %1, %c0_i32 : i32
    %c0_i32_0 = arith.constant 0 : i32
    %c0_i32_1 = arith.constant 0 : i32
    return %c0_i32_0, %2 : i32, i32
  }
  func.func @transform_3(%arg0: i32, %arg1: i32) -> (i32, i32) {
    %c1_i32 = arith.constant 1 : i32
    %0 = arith.muli %arg0, %c1_i32 : i32
    %1 = arith.addi %0, %arg1 : i32
    %c1_i32_0 = arith.constant 1 : i32
    %2 = arith.subi %1, %c1_i32_0 : i32
    %c0_i32 = arith.constant 0 : i32
    %c0_i32_1 = arith.constant 0 : i32
    %3 = arith.maxsi %c0_i32, %2 : i32
    %4 = arith.minsi %c0_i32_1, %3 : i32
    %c0_i32_2 = arith.constant 0 : i32
    %c0_i32_3 = arith.constant 0 : i32
    return %c0_i32_2, %4 : i32, i32
  }
  func.func @transform_4(%arg0: i32, %arg1: i32) -> (i32, i32) {
    %c1_i32 = arith.constant 1 : i32
    %0 = arith.muli %arg0, %c1_i32 : i32
    %1 = arith.addi %0, %arg1 : i32
    %c1_i32_0 = arith.constant 1 : i32
    %2 = arith.subi %1, %c1_i32_0 : i32
    %c0_i32 = arith.constant 0 : i32
    %c0_i32_1 = arith.constant 0 : i32
    %3 = arith.maxsi %c0_i32, %2 : i32
    %4 = arith.minsi %c0_i32_1, %3 : i32
    %c0_i32_2 = arith.constant 0 : i32
    %c0_i32_3 = arith.constant 0 : i32
    return %c0_i32_2, %4 : i32, i32
  }
  func.func @transform_5(%arg0: i32, %arg1: i32) -> (i32, i32) {
    %c1_i32 = arith.constant 1 : i32
    %0 = arith.muli %arg0, %c1_i32 : i32
    %1 = arith.addi %0, %arg1 : i32
    %c1_i32_0 = arith.constant 1 : i32
    %2 = arith.subi %1, %c1_i32_0 : i32
    %c0_i32 = arith.constant 0 : i32
    %c0_i32_1 = arith.constant 0 : i32
    %3 = arith.maxsi %c0_i32, %2 : i32
    %4 = arith.minsi %c0_i32_1, %3 : i32
    %c0_i32_2 = arith.constant 0 : i32
    %c0_i32_3 = arith.constant 0 : i32
    return %c0_i32_2, %4 : i32, i32
  }
  func.func @transform_6(%arg0: i32, %arg1: i32) -> (i32, i32, i32) {
    %c0_i32 = arith.constant 0 : i32
    %c0_i32_0 = arith.constant 0 : i32
    %c0_i32_1 = arith.constant 0 : i32
    return %arg0, %c0_i32, %c0_i32_0 : i32, i32, i32
  }
  func.func @transform_7(%arg0: i32, %arg1: i32) -> (i32, i32, i32) {
    %c0_i32 = arith.constant 0 : i32
    %c0_i32_0 = arith.constant 0 : i32
    %c0_i32_1 = arith.constant 0 : i32
    return %arg0, %c0_i32, %c0_i32_0 : i32, i32, i32
  }
  func.func @transform_8(%arg0: i32, %arg1: i32) -> (i32, i32, i32) {
    %c0_i32 = arith.constant 0 : i32
    %c0_i32_0 = arith.constant 0 : i32
    %c0_i32_1 = arith.constant 0 : i32
    return %arg0, %c0_i32, %c0_i32_0 : i32, i32, i32
  }
  func.func @transform_9(%arg0: i32, %arg1: i32) -> (i32, i32, i32) {
    %c0_i32 = arith.constant 0 : i32
    %c0_i32_0 = arith.constant 0 : i32
    %c0_i32_1 = arith.constant 0 : i32
    return %arg0, %c0_i32, %c0_i32_0 : i32, i32, i32
  }
}

</mosaic_0001>

<bundles_post_ra>
// kernel: tpu_custom_call.1
= control target key start
LH: loop header
LB: loop body
LE: loop exit
PB: predicated region body
PF: predicated region fallthrough
CT: control target
= control target key end

     0   :  { %s2049_s0 = inlined_call_operand.hbm [shape: bf16[8,256], index: 0, kind: input, shape index: {}]   ;;  %s2050_s1 = inlined_call_operand.hbm [shape: bf16[8,256], index: 1, kind: input, shape index: {}]   ;;  %s2051_s2 = inlined_call_operand.hbm [shape: s8[8,256], index: 2, kind: input, shape index: {}]   ;;  %s2052_s3 = inlined_call_operand.hbm [shape: bf16[8,128], index: 3, kind: input, shape index: {}]   ;;  %s2053_s4 = inlined_call_operand.hbm [shape: bf16[8,128], index: 4, kind: input, shape index: {}]   ;;  %s2054_s5 = inlined_call_operand.vmem [shape: s8[8,128], index: 5, kind: input, shape index: {}]   ;;  %s2055_s6 = inlined_call_operand.hbm [shape: f32[2,8,128], index: 6, kind: output, shape index: {0}]   ;;  %s2056_s7 = inlined_call_operand.hbm [shape: f32[2,8,128], index: 7, kind: output, shape index: {1}]   ;;  %s2057_s8 = inlined_call_operand.hbm [shape: f32[2,8,128], index: 8, kind: output, shape index: {2}]   ;;  %s2058_s9 = inlined_call_operand.hbm [shape: f32[2,8,128], index: 9, kind: output, shape index: {3}]  }
   0x1   :  { %2069 = sst [smem:[#allocation30_spill]] %s2050_s1 }
   0x2   :  { %2070 = sst [smem:[#allocation31_spill]] %s2052_s3 }
   0x3   :  { %2071 = sst [smem:[#allocation32_spill]] %s2058_s9 }
   0x4   :  { %15 = vsyncpa [#allocation3], 0 }
   0x5   :  { %17 = vsyncpa [#allocation3 + $0x1], 0 }
   0x6   :  { %18 = vsyncpa [#allocation6], 0 }
   0x7   :  { %20 = vsyncpa [#allocation6 + $0x1], 0 }
   0x8   :  { %21 = vsyncpa [#allocation9], 0 }
   0x9   :  { %23 = vsyncpa [#allocation9 + $0x1], 0 }
   0xa   :  { %24 = vsyncpa [#allocation4], 0 }
   0xb   :  { %26 = vsyncpa [#allocation4 + $0x1], 0 }
   0xc   :  { %27 = vsyncpa [#allocation13], 0 }
   0xd   :  { %29 = vsyncpa [#allocation13 + $0x1], 0 }
   0xe   :  { %30 = vsyncpa [#allocation16], 0 }
   0xf   :  { %32 = vsyncpa [#allocation16 + $0x1], 0  ;;  %s1734_s30 = smov 0   ;;  %s1736_s10 = smov 0  }
  0x10   :  { %s1738_s11 = smov 0   ;;  %s1740_s12 = smov 0  }
  0x11   :  { %s1742_s13 = smov 0   ;;  %s1744_s14 = smov 0  }
  0x12   :  { %s1746_s15 = smov 0   ;;  %s1748_s16 = smov 0  }
  0x13 LB: > { %2072 = sst [smem:[#allocation23_spill]] %s1648_s30  ;;  %s1773_s17 = sadd.s32 4294967295, %s1676_s16   ;;  %s1676_s16 = sphi %s1748_s16, %s38_s16   ;;  %s1672_s15 = sphi %s1746_s15, %s2100_s15   ;;  %s1668_s14 = sphi %s1744_s14, %s2099_s14   ;;  %s1664_s13 = sphi %s1742_s13, %s2039_s13   ;;  %s1660_s12 = sphi %s1740_s12, %s2103_s12   ;;  %s1656_s11 = sphi %s1738_s11, %s2098_s11   ;;  %s1652_s10 = sphi %s1736_s10, %s2102_s10   ;;  %s1648_s30 = sphi %s1734_s30, %s2101_s30  }
  0x14   : > { %2073 = sst [smem:[#allocation24_spill]] %s1656_s11  ;;  %s2059_s18 = sadd.s32 4294967294, %s1676_s16  }
  0x15   : > { %2074 = sst [smem:[#allocation25_spill]] %s1672_s15  ;;  %s50_s19 = sadd.s32 1, %s1672_s15 }
  0x16   : > { %2075 = sst [smem:[#allocation26_spill]] %s1676_s16  ;;  %p52_p0 = scmp.ge.s32.totalorder %s50_s19, 2 }
  0x17   : > { %p1645_p1 = scmp.ne.s32.totalorder %s1664_s13, 0  ;;  %p71_p2 = scmp.eq.s32.totalorder %s1676_s16, 0 }
  0x18   : > { %s2105_s19 = smov (%p52_p0, %s50_s19), 0  ;;  %p76_p3 = scmp.ne.s32.totalorder %s1664_s13, %s1660_s12 }
  0x19   : > { %2076 = sst [smem:[#allocation27_spill]] %s2105_s19  ;;  %p1784_p4 = por %p1645_p1, %p71_p2 }
  0x1a   : > { %p2062_p5 = scmp.eq.s32.totalorder %s1773_s17, 0  ;;  %s264_s22 = ssub.s32 %s1672_s15, %s2105_s19 }
  0x1b   : > { %p265_p7 = scmp.eq.s32.totalorder %s264_s22, 0  ;;  %s267_s23 = sadd.s32 1, %s1656_s11 }
  0x1c   : > { %p1791_p6 = por %p2062_p5, %p76_p3  ;;  %p277_p8 = scmp.ne.s32.totalorder %s1656_s11, %s1652_s10 }
  0x1d   : > { %s1799_s24 = scalar_select %p265_p7, %s1656_s11, %s267_s23  }
  0x1e   : > { %p278_p9 = scmp.eq.s32.totalorder %s1773_s17, 1  ;;  %p283_p10 = scmp.ne.s32.totalorder %s1652_s10, %s1648_s30 }
  0x1f   : > { %2079 = sst [smem:[#allocation28_spill]] %s1799_s24  ;;  %p284_p11 = scmp.eq.s32.totalorder %s2059_s18, 1 }
  0x20   : > { %p1808_p12 = por %p278_p9, %p277_p8  ;;  %p1246_p1 = scmp.lt.s32.totalorder %s1676_s16, 2 }
  0x21   : > { %p1813_p0 = por %p284_p11, %p283_p10  ;;  %s405_s28 = sand.u32 1, %s1676_s16  }
  0x22   : > { %p1822_p3 = pnand %p1246_p1, %p1784_p4  ;;  %s1678_s29 = smov [#allocation5]  }
  0x23   : > { %s2081_s26 = scalar_select %p1813_p0, 1, 0 }
  0x24   : > { %s421_s12 = sshll.u32 %s1678_s29, 4  ;;  %s2084_s1 = sld [smem:[#allocation30_spill]]  ;;  %s422_s12 = int_to_ptr.vmem [resolvable:$true] %s421_s12 }
  0x25   : > { %2082 = sst [smem:[#allocation29_spill]] %s2081_s26  ;;  %p1168_p7 = scmp.ge.s32.totalorder %s1676_s16, 1 }
  0x26   : > { %s1831_s19 = scalar_lea.sflag [#allocation6], %s405_s28  ;;  %p1327_p8 = pneg %p1822_p3 }
  0x2a   : > { %s419_s18 = sshll.u32 %s2084_s1, 4  ;;  %s1330_s22 = scalar_lea.hbm %s2084_s1, 8  ;;  %s420_s18 = int_to_ptr.hbm [resolvable:$true] %s419_s18 }
  0x2b   : > { %s1323_s20 = sshra.s32 %s420_s18, 4  ;;  %s1324_s20 = int_to_ptr.hbm [resolvable:$true] %s1323_s20 }
  0x2c   : > { %s1325_s15 = scalar_lea.hbm %s1324_s20, 8 }
  0x2d   : > { %p1326_p4 = scmp.ne.s32.totalorder %s1324_s20, %s1325_s15  ;;  %p1332_p11 = scmp.lt.s32.totalorder %s1330_s22, %s1325_s15 }
  0x2f   : > { %p1328_p9 = pnand %p1327_p8, %p1326_p4 }
  0x31   : > { %p1329_p10 = pneg %p1328_p9 }
  0x33   : > { %p1334_p13 = pnand %p1332_p11, %p1329_p10 }
  0x35   : > { %1337 = shalt.err (!%p1334_p13)
}
  0x36   : > { %1223 = dma.hbm_to_vmem [thread:$0]  (!%p1822_p3), %s420_s18, 128, %s422_s12, %s1831_s19  }
  0x37   : > { %p518_p5 = scmp.lt.s32.totalorder %s1676_s16, 3  ;;  %s2085_s3 = sld [smem:[#allocation31_spill]] }
  0x38   : > { %s1679_s15 = smov [#allocation8]   ;;  %p1858_p13 = pnand %p1246_p1, %p71_p2 }
  0x39   : > { %p1850_p4 = pnand %p1168_p7, %p518_p5  ;;  %s469_s29 = sshll.u32 %s1679_s15, 4  ;;  %s470_s29 = int_to_ptr.vmem [resolvable:$true] %s469_s29 }
  0x3a   : > { %s1862_s18 = scalar_lea.sflag [#allocation9], %s405_s28  ;;  %s1680_s12 = smov [#allocation2]  }
  0x3b   : > { %s398_s23 = sshll.u32 %s1680_s12, 4  ;;  %s399_s23 = int_to_ptr.vmem [resolvable:$true] %s398_s23 }
  0x3d   : > { %s467_s11 = sshll.u32 %s2085_s3, 4  ;;  %s396_s3 = sshll.u32 %s2049_s0, 4  ;;  %s468_s11 = int_to_ptr.hbm [resolvable:$true] %s467_s11  ;;  %s397_s3 = int_to_ptr.hbm [resolvable:$true] %s396_s3 }
  0x3e   : > { %1229 = dma.hbm_to_vmem [thread:$0]  (!%p1858_p13), %s468_s11, 64, %s470_s29, %s1862_s18  }
  0x3f   : > { %s1383_s15 = sshra.s32 %s397_s3, 4  ;;  %s1390_s11 = scalar_lea.hbm %s2049_s0, 8  ;;  %s1384_s15 = int_to_ptr.hbm [resolvable:$true] %s1383_s15 }
  0x40   : > { %s1385_s16 = scalar_lea.hbm %s1384_s15, 8 }
  0x41   : > { %p1386_p2 = scmp.ne.s32.totalorder %s1384_s15, %s1385_s16  ;;  %p1392_p7 = scmp.lt.s32.totalorder %s1390_s11, %s1385_s16 }
  0x43   : > { %p1388_p5 = pnand %p1386_p2, %p1327_p8 }
  0x45   : > { %p1389_p1 = pneg %p1388_p5 }
  0x47   : > { %p1394_p9 = pnand %p1392_p7, %p1389_p1 }
  0x49   : > { %1397 = shalt.err (!%p1394_p9)
}
  0x4a   : > { %1220 = dma.hbm_to_vmem [thread:$0]  (!%p1822_p3), %s397_s3, 128, %s399_s23, [#allocation3]  }
  0x4b   : > { %s1681_s1 = smov [#allocation7]   ;;  %s442_s15 = sshll.u32 %s2051_s2, 4  ;;  %s443_s15 = int_to_ptr.hbm [resolvable:$true] %s442_s15 }
  0x4c   : > { %s444_s29 = sshll.u32 %s1681_s1, 4  ;;  %s492_s26 = sshll.u32 %s2053_s4, 4  ;;  %s445_s29 = int_to_ptr.vmem [resolvable:$true] %s444_s29  ;;  %s493_s26 = int_to_ptr.hbm [resolvable:$true] %s492_s26 }
  0x4d   : > { %s1413_s28 = sshra.s32 %s443_s15, 4  ;;  %s1420_s11 = scalar_lea.hbm %s2051_s2, 4  ;;  %s1414_s28 = int_to_ptr.hbm [resolvable:$true] %s1413_s28 }
  0x4e   : > { %s1415_s16 = scalar_lea.hbm %s1414_s28, 4 }
  0x4f   : > { %p1416_p10 = scmp.ne.s32.totalorder %s1414_s28, %s1415_s16  ;;  %p1422_p5 = scmp.lt.s32.totalorder %s1420_s11, %s1415_s16 }
  0x51   : > { %p1418_p11 = pnand %p1416_p10, %p1327_p8 }
  0x53   : > { %p1419_p2 = pneg %p1418_p11 }
  0x55   : > { %p1424_p1 = pnand %p1422_p5, %p1419_p2 }
  0x57   : > { %1427 = shalt.err (!%p1424_p1)
}
  0x58   : > { %1226 = dma.hbm_to_vmem [thread:$0]  (!%p1822_p3), %s443_s15, 64, %s445_s29, %s1831_s19  }
  0x59   : > { %s1682_s9 = smov [#allocation10]   ;;  %522 = sbr.rel (%p1850_p4) target bundleno = 214 (0xd6), region = 44 }
  0x5a   : > { %s494_s30 = sshll.u32 %s1682_s9, 4  ;;  %s524_s1 = sand.u32 (!%p1850_p4), 1, %s1664_s13   ;;  %s495_s30 = int_to_ptr.vmem [resolvable:$true] %s494_s30 }
  0x5b   : > { %1232 = dma.hbm_to_vmem [thread:$0]  (!%p1858_p13), %s493_s26, 64, %s495_s30, %s1862_s18  }
  0x5c   : > { %s1169_s12 = sshll.u32 (!%p1850_p4), %s524_s1, 3  ;;  %s525_s20 = scalar_lea.sflag (!%p1850_p4), [#allocation3], %s524_s1 }
  0x5d   : > { %s528_s28 = scalar_lea.vmem (!%p1850_p4), [#allocation2], %s1169_s12 }
  0x5e   : > { %1622 = dma.done.wait (%p1791_p6), %s525_s20, 128  }
  0x5f   : > { %1624 = vsyncadd (%p1791_p6), %s525_s20, 4294967168  ;;  %s1904_s19 = sand.u32 1, %s1773_s17   ;;  %s538_s22 = scalar_lea.vmem [#allocation5], %s1169_s12 }
  0x60   : > { %s535_s27 = scalar_lea.sflag [#allocation6], %s1904_s19 }
  0x61   : > { %1626 = dma.done.wait (%p1791_p6), %s535_s27, 192  }
  0x62   : > { %1628 = vsyncadd (%p1791_p6), %s535_s27, 4294967104  ;;  %s1171_s24 = sshll.u32 %s524_s1, 2  ;;  %s555_s29 = scalar_lea.sflag [#allocation9], %s1904_s19 }
  0x63   : > { %s548_s18 = scalar_lea.vmem [#allocation7], %s1171_s24  ;;  %p2088_p3 = scmp.eq.s32.totalorder %s1773_s17, 0 }
  0x65   : > { %1630 = dma.done.wait (%p2088_p3), %s555_s29, 128   ;;  %p2089_p8 = pmov %p2088_p3 }
  0x66   : > { %s1917_s15 = sand.u32 1, %s1652_s10   ;;  %v1683_v0 = vmov 0.0   ;;  %p1185_p6 = scmp.ge.s32.totalorder %s1668_s14, 1 }
  0x67   : > { %1632 = vsyncadd (%p2089_p8), %s555_s29, 4294967168  ;;  %s1174_s26 = sshll.u32 %s1917_s15, 3 }
  0x68   : > { %s1920_s16 = scalar_lea.vmem [#allocation11], %s1174_s26  ;;  %s1923_s21 = scalar_lea.vmem [#allocation12], %s1174_s26 }
  0x69   : > { %694 = vst [vmem:[%s1920_s16] sm:$0xff] %v1683_v0  ;;  %s1926_s3 = scalar_lea.vmem [#allocation14], %s1174_s26  ;;  %s1929_s17 = scalar_lea.vmem [#allocation15], %s1174_s26 }
  0x6a   : > { %695 = vst [vmem:[%s1923_s21] sm:$0xff] %v1683_v0  ;;  %701 = sbr.rel (%p1185_p6) target bundleno = 128 (0x80), region = 72 }
  0x6b   : > { %696 = vst [vmem:[%s1926_s3] sm:$0xff] %v1683_v0 }
  0x6c   : > { %697 = vst [vmem:[%s1929_s17] sm:$0xff] %v1683_v0 }
  0x6f   : > { %v702_v1 = vld [vmem:[%s548_s18] sm:$0xf]  ;;  %v716_v3 = vld [vmem:[%s538_s22] sm:$0xff] }
  0x70   : > { %v713_v2 = vld [vmem:[%s528_s28] sm:$0xff]  ;;  %v703_v4 = vunpack.c.0.s8 %v702_v1  ;;  %v704_v5 = vunpack.c.1.s8 %v702_v1  ;;  %v717_v8 = vunpack.c.l.bf16 %v716_v3  ;;  %v718_v9 = vunpack.c.h.bf16 %v716_v3  ;;  %v725_v25 = vld [vmem:[%s1920_s16] sm:$0xff] }
  0x71   : > { %v714_v6 = vunpack.c.l.bf16 %v713_v2  ;;  %v715_v7 = vunpack.c.h.bf16 %v713_v2  ;;  %v729_v18 = vld [vmem:[%s1923_s21] sm:$0xff] }
  0x72   : > { %v705_v10 = vcvt.s32.f32 %v703_v4  ;;  %v706_v11 = vcvt.s32.f32 %v704_v5 }
  0x73   : > { %v719_v12 = vsub.f32 %v714_v6, %v717_v8  ;;  %v720_v13 = vsub.f32 %v715_v7, %v718_v9 }
  0x74   : > { %vm707_vm0 = vcmp.gt.f32.partialorder %v705_v10, 0.0  ;;  %vm708_vm1 = vcmp.gt.f32.partialorder %v706_v11, 0.0  ;;  %v709_v14 = vsub.f32 1.0, %v705_v10  ;;  %v710_v15 = vsub.f32 1.0, %v706_v11 }
  0x76   : > { %v711_v16 = vsel %vm707_vm0, 0.0, %v709_v14  ;;  %v712_v17 = vsel %vm708_vm1, 0.0, %v710_v15 }
  0x77   : > { %v721_v19 = vmul.f32 %v719_v12, %v711_v16  ;;  %v722_v20 = vmul.f32 %v720_v13, %v712_v17  ;;  %v730_v21 = vadd.f32 %v712_v17, %v711_v16 }
  0x79   : > { %v723_v22 = vand.u32 2147483647, %v721_v19  ;;  %v724_v23 = vand.u32 2147483647, %v722_v20  ;;  %v731_v24 = vadd.f32 %v730_v21, %v729_v18 }
  0x7b   : > { %v726_v26 = vadd.f32 %v724_v23, %v723_v22  ;;  %732 = vst [vmem:[%s1923_s21] sm:$0xff] %v731_v24 }
  0x7d   : > { %v727_v27 = vadd.f32 %v726_v26, %v725_v25 }
  0x7f   : > { %728 = vst [vmem:[%s1920_s16] sm:$0xff] %v727_v27 }
  0x80 PF: > { %p734_p4 = scmp.lt.s32.totalorder %s1668_s14, 2 }
  0x82   : > { %p735_p13 = pnand %p1185_p6, %p734_p4 }
  0x84   : > { %738 = sbr.rel (%p735_p13) target bundleno = 152 (0x98), region = 76 }
  0x89   : > { %v739_v28 = vld [vmem:[%s2054_s5] sm:$0x3]  ;;  %v745_v29 = vld [vmem:[#allocation8] sm:$0xf]  ;;  %v747_v30 = vld [vmem:[#allocation10] sm:$0xf] }
  0x8a   : > { %v740_v31 = vunpack.c.0.s8 %v739_v28  ;;  %v746_v32 = vunpack.c.l.bf16 %v745_v29  ;;  %v748_v33 = vunpack.c.l.bf16 %v747_v30  ;;  %v755_v37 = vld [vmem:[%s1929_s17] sm:$0xff]  ;;  %v752_v41 = vld [vmem:[%s1926_s3] sm:$0xff] }
  0x8c   : > { %v741_v34 = vcvt.s32.f32 %v740_v31  ;;  %v749_v35 = vsub.f32 %v746_v32, %v748_v33 }
  0x8e   : > { %vm742_vm2 = vcmp.gt.f32.partialorder %v741_v34, 0.0  ;;  %v743_v36 = vsub.f32 1.0, %v741_v34 }
  0x90   : > { %v744_v38 = vsel %vm742_vm2, 0.0, %v743_v36 }
  0x91   : > { %v750_v39 = vmul.f32 %v749_v35, %v744_v38  ;;  %v756_v40 = vadd.f32 %v755_v37, %v744_v38 }
  0x93   : > { %v751_v42 = vand.u32 2147483647, %v750_v39  ;;  %757 = vst [vmem:[%s1929_s17] sm:$0xff] %v756_v40 }
  0x95   : > { %v753_v43 = vadd.f32 %v752_v41, %v751_v42 }
  0x97   : > { %754 = vst [vmem:[%s1926_s3] sm:$0xff] %v753_v43 }
  0x98 PF: > { %s1950_s9 = sshll.u32 %s1668_s14, 3  ;;  %s800_s20 = sshll.u32 %s1923_s21, 4  ;;  %s801_s20 = int_to_ptr.vmem [resolvable:$true] %s800_s20 }
  0x99   : > { %s798_s12 = scalar_lea.hbm %s2056_s7, %s1950_s9  ;;  %s764_s27 = scalar_lea.sflag [#allocation13], %s1904_s19 }
  0x9a   : > { %s802_s28 = sshll.u32 %s798_s12, 4  ;;  %s1493_s29 = scalar_lea.hbm %s2056_s7, 16  ;;  %s803_s28 = int_to_ptr.hbm [resolvable:$true] %s802_s28 }
  0x9b   : > { %s1487_s22 = sshra.s32 %s803_s28, 4  ;;  %s1488_s22 = int_to_ptr.hbm [resolvable:$true] %s1487_s22 }
  0x9c   : > { %s1489_s24 = scalar_lea.hbm %s1488_s22, 8  ;;  %p1494_p11 = scmp.lt.s32.totalorder %s1488_s22, %s2056_s7 }
  0x9d   : > { %p1490_p7 = scmp.ne.s32.totalorder %s1488_s22, %s1489_s24  ;;  %p1495_p2 = scmp.lt.s32.totalorder %s1493_s29, %s1489_s24 }
  0x9f   : > { %p1491_p9 = pnand %p1490_p7, %p1808_p12  ;;  %p1496_p5 = por %p1495_p2, %p1494_p11 }
  0xa1   : > { %p1492_p10 = pneg %p1491_p9 }
  0xa3   : > { %p1497_p1 = pnand %p1496_p5, %p1492_p10 }
  0xa5   : > { %1500 = shalt.err (!%p1497_p1)
}
  0xa6   : > { %1210 = dma.vmem_to_hbm [thread:$0]  (%p1808_p12), %s801_s20, 128, %s803_s28, %s764_s27  }
  0xa7   : > { %s784_s30 = scalar_lea.hbm %s2055_s6, %s1950_s9  ;;  %s786_s1 = sshll.u32 %s1920_s16, 4  ;;  %s787_s1 = int_to_ptr.vmem [resolvable:$true] %s786_s1 }
  0xa8   : > { %s788_s12 = sshll.u32 %s784_s30, 4  ;;  %s812_s18 = scalar_lea.hbm %s2057_s8, %s1950_s9  ;;  %s789_s12 = int_to_ptr.hbm [resolvable:$true] %s788_s12 }
  0xa9   : > { %s759_s14 = scalar_lea.sflag [#allocation4], %s1917_s15  ;;  %s1515_s29 = sshra.s32 %s789_s12, 4  ;;  %s1516_s29 = int_to_ptr.hbm [resolvable:$true] %s1515_s29 }
  0xaa   : > { %s1517_s26 = scalar_lea.hbm %s1516_s29, 8  ;;  %s1521_s23 = scalar_lea.hbm %s2055_s6, 16 }
  0xab   : > { %p1518_p3 = scmp.ne.s32.totalorder %s1516_s29, %s1517_s26  ;;  %p1522_p4 = scmp.lt.s32.totalorder %s1516_s29, %s2055_s6 }
  0xac   : > { %p1523_p13 = scmp.lt.s32.totalorder %s1521_s23, %s1517_s26 }
  0xad   : > { %p1519_p8 = pnand %p1518_p3, %p1808_p12 }
  0xae   : > { %p1524_p7 = por %p1523_p13, %p1522_p4 }
  0xaf   : > { %p1520_p6 = pneg %p1519_p8 }
  0xb1   : > { %p1525_p9 = pnand %p1524_p7, %p1520_p6 }
  0xb3   : > { %1528 = shalt.err (!%p1525_p9)
}
  0xb4   : > { %1209 = dma.vmem_to_hbm [thread:$0]  (%p1808_p12), %s787_s1, 128, %s789_s12, %s759_s14  }
  0xb5   : > { %s814_s11 = sshll.u32 %s1926_s3, 4  ;;  %s816_s30 = sshll.u32 %s812_s18, 4  ;;  %s815_s11 = int_to_ptr.vmem [resolvable:$true] %s814_s11  ;;  %s817_s30 = int_to_ptr.hbm [resolvable:$true] %s816_s30 }
  0xb6   : > { %s1543_s22 = sshra.s32 %s817_s30, 4  ;;  %s1549_s20 = scalar_lea.hbm %s2057_s8, 16  ;;  %s1544_s22 = int_to_ptr.hbm [resolvable:$true] %s1543_s22 }
  0xb7   : > { %s1545_s24 = scalar_lea.hbm %s1544_s22, 8  ;;  %p1550_p5 = scmp.lt.s32.totalorder %s1544_s22, %s2057_s8 }
  0xb8   : > { %p1546_p10 = scmp.ne.s32.totalorder %s1544_s22, %s1545_s24  ;;  %p1551_p1 = scmp.lt.s32.totalorder %s1549_s20, %s1545_s24 }
  0xba   : > { %p1547_p11 = pnand %p1546_p10, %p1808_p12  ;;  %p1552_p3 = por %p1551_p1, %p1550_p5 }
  0xbc   : > { %p1548_p2 = pneg %p1547_p11 }
  0xbe   : > { %p1553_p8 = pnand %p1552_p3, %p1548_p2 }
  0xc0   : > { %1556 = shalt.err (!%p1553_p8)
}
  0xc1   : > { %1211 = dma.vmem_to_hbm [thread:$0]  (%p1808_p12), %s815_s11, 128, %s817_s30, %s764_s27  }
  0xc2   : > { %s2090_s12 = sld [smem:[#allocation32_spill]]  ;;  %s828_s16 = sshll.u32 %s1929_s17, 4  ;;  %s829_s16 = int_to_ptr.vmem [resolvable:$true] %s828_s16 }
  0xc3   : > { %s774_s22 = scalar_lea.sflag [#allocation16], %s1917_s15 }
  0xc8   : > { %s2091_s18 = smov %s2090_s12  ;;  %s826_s14 = scalar_lea.hbm %s2090_s12, %s1950_s9 }
  0xc9   : > { %s830_s21 = sshll.u32 %s826_s14, 4  ;;  %s1577_s27 = scalar_lea.hbm %s2091_s18, 16  ;;  %s831_s21 = int_to_ptr.hbm [resolvable:$true] %s830_s21 }
  0xca   : > { %s1571_s24 = sshra.s32 %s831_s21, 4  ;;  %s1572_s24 = int_to_ptr.hbm [resolvable:$true] %s1571_s24 }
  0xcb   : > { %s1573_s29 = scalar_lea.hbm %s1572_s24, 8  ;;  %p1578_p7 = scmp.lt.s32.totalorder %s1572_s24, %s2091_s18 }
  0xcc   : > { %p1574_p6 = scmp.ne.s32.totalorder %s1572_s24, %s1573_s29  ;;  %p1579_p9 = scmp.lt.s32.totalorder %s1577_s27, %s1573_s29 }
  0xce   : > { %p1575_p4 = pnand %p1574_p6, %p1808_p12  ;;  %p1580_p10 = por %p1579_p9, %p1578_p7 }
  0xd0   : > { %p1576_p13 = pneg %p1575_p4 }
  0xd2   : > { %p1581_p11 = pnand %p1580_p10, %p1576_p13 }
  0xd4   : > { %1584 = shalt.err (!%p1581_p11)
}
  0xd5   : > { %1212 = dma.vmem_to_hbm [thread:$0]  (%p1808_p12), %s829_s16, 128, %s831_s21, %s774_s22  }
  0xd6 PF: > { %s2092_s15 = sld [smem:[#allocation23_spill]] }
  0xd7   : > { %s2094_s9 = sld [smem:[#allocation26_spill]] }
  0xdc   : > { %s842_s20 = sand.u32 1, %s2092_s15  }
  0xdd   : > { %p2095_p2 = scmp.ge.s32.totalorder %s2094_s9, 2  ;;  %s843_s28 = scalar_lea.sflag [#allocation4], %s842_s20 }
  0xdf   : > { %p1234_p5 = pnand %p2095_p2, %p1813_p0 }
  0xe1   : > { %p1235_p1 = pneg %p1234_p5 }
  0xe3   : > { %1634 = dma.done.wait (%p1235_p1), %s843_s28, 128  }
  0xe4   : > { %1636 = vsyncadd (%p1235_p1), %s843_s28, 4294967168  ;;  %s2096_s23 = sadd.s32 4294967294, %s2094_s9  }
  0xe5   : > { %s852_s3 = sand.u32 1, %s2096_s23  }
  0xe6   : > { %s853_s1 = scalar_lea.sflag [#allocation13], %s852_s3 }
  0xe7   : > { %1638 = dma.done.wait (%p1235_p1), %s853_s1, 256  }
  0xe8   : > { %1640 = vsyncadd (%p1235_p1), %s853_s1, 4294967040  ;;  %s873_s25 = scalar_lea.sflag [#allocation16], %s842_s20 }
  0xe9   : > { %1642 = dma.done.wait (%p1235_p1), %s873_s25, 128  }
  0xea   : > { %1644 = vsyncadd (%p1235_p1), %s873_s25, 4294967168  ;;  %s38_s16 = sadd.s32 1, %s2094_s9   ;;  %s2097_s12 = sld [smem:[#allocation24_spill]] }
  0xeb   : > { %p35_p12 = scmp.ge.s32.totalorder %s38_s16, 4   ;;  %s2098_s11 = sld [smem:[#allocation28_spill]] }
  0xec   : > { %s2099_s14 = sld [smem:[#allocation25_spill]]  ;;  %s2101_s30 = smov %s1652_s10 }
  0xed   : > { %s2100_s15 = sld [smem:[#allocation27_spill]]  ;;  %37 = sbr.rel (!%p35_p12) target bundleno = 19 (0x13), region = 201 }
  0xf0   : > { %s2102_s10 = smov %s2097_s12  ;;  %s2103_s12 = smov %s1664_s13 }
  0xf1   : > { %s2039_s13 = smov 0  }
  0xf2   :  { %879 = vsyncpa [#allocation3], 1 }
  0xf3   :  { %881 = vsyncpa [#allocation3 + $0x1], 1 }
  0xf4   :  { %882 = vsyncpa [#allocation6], 1 }
  0xf5   :  { %884 = vsyncpa [#allocation6 + $0x1], 1 }
  0xf6   :  { %885 = vsyncpa [#allocation9], 1 }
  0xf7   :  { %887 = vsyncpa [#allocation9 + $0x1], 1 }
  0xf8   :  { %888 = vsyncpa [#allocation4], 1 }
  0xf9   :  { %890 = vsyncpa [#allocation4 + $0x1], 1 }
  0xfa   :  { %891 = vsyncpa [#allocation13], 1 }
  0xfb   :  { %893 = vsyncpa [#allocation13 + $0x1], 1 }
  0xfc   :  { %894 = vsyncpa [#allocation16], 1 }
  0xfd   :  { %896 = vsyncpa [#allocation16 + $0x1], 1 }

</bundles_post_ra>
